<compile_context>
chip_gen: v7x
topology: tpu7x:2x2x1
jax: 0.10.0
libtpu: 0.0.40
codegen_flags: <defaults>
</compile_context>

<pallas_src>
import jax
import jax.numpy as jnp
from jax.experimental import pallas as pl
from jax.experimental.pallas import tpu as pltpu

LANE = 128
SUBLANE = 8


def _round_up(n, m):
    return ((n + m - 1) // m) * m


def mlp_kernel(*refs):
    """One batch tile through the whole (padded) MLP; everything is in VMEM."""
    x_ref, o_ref = refs[0], refs[-1]
    param_refs = refs[1:-1]
    n_layers = len(param_refs) // 2

    h = x_ref[...]                                   # bf16 (TB, in_dim)
    for li in range(n_layers):
        w_ref = param_refs[2 * li]
        b_ref = param_refs[2 * li + 1]
        # MXU matmul with f32 accumulation; bias add in f32.
        y = jnp.dot(h, w_ref[...], preferred_element_type=jnp.float32)
        y = y + b_ref[...]
        if li < n_layers - 1:
            # ReLU in f32, then back to bf16 for the next MXU matmul.
            h = jnp.maximum(y, 0.0).astype(jnp.bfloat16)
        else:
            o_ref[...] = y.astype(o_ref.dtype)       # lane-dense (TB, 128) store


def mlp_forward(x, params, *, max_batch_tile=512):
    """x: [B, input_size] f32; params: list of (w=[in,out] f32, b=[1,out] f32)."""
    B, in_dim = x.shape
    out_dim = params[-1][0].shape[1]

    # ---- pad feature dims to full 128-lane width; cast matmul operands to bf16.
    padded = []
    prev_p = in_dim                                   # keep the tiny input width as-is
    for (w, b) in params:
        f_in, f_out = w.shape
        p_out = _round_up(f_out, LANE)
        w_p = jnp.zeros((prev_p, p_out), jnp.float32).at[:f_in, :f_out].set(w)
        b_p = jnp.zeros((1, p_out), jnp.float32).at[:, :f_out].set(b)
        padded.append((w_p.astype(jnp.bfloat16), b_p))  # bias stays f32
        prev_p = p_out
    p_out_final = prev_p

    # ---- batch tiling: TB multiple of 8 sublanes, B padded to a whole grid.
    tb = min(max_batch_tile, _round_up(B, SUBLANE))
    tb = _round_up(tb, SUBLANE)
    b_pad = _round_up(B, tb)
    x_p = x
    if b_pad != B:
        x_p = jnp.zeros((b_pad, in_dim), x.dtype).at[:B].set(x)
    x_p = x_p.astype(jnp.bfloat16)

    flat_params = []
    for w, b in padded:
        flat_params.append(w)
        flat_params.append(b)

    # Activations/output: tiled over the batch grid (auto double-buffered).
    x_spec = pl.BlockSpec((tb, in_dim), lambda i: (i, 0))
    o_spec = pl.BlockSpec((tb, p_out_final), lambda i: (i, 0))
    # Weights/biases: full-array blocks with a constant index_map -> fetched
    # once, resident in VMEM for every grid step.
    param_specs = [pl.BlockSpec(p.shape, lambda i: (0, 0)) for p in flat_params]

    grid = (b_pad // tb,)
    out_padded = pl.pallas_call(
        mlp_kernel,
        out_shape=jax.ShapeDtypeStruct((b_pad, p_out_final), jnp.float32),
        grid_spec=pltpu.PrefetchScalarGridSpec(
            num_scalar_prefetch=0,
            grid=grid,
            in_specs=[x_spec] + param_specs,
            out_specs=o_spec,
        ),
        compiler_params=pltpu.CompilerParams(
            # Batch tiles are independent -> shard the grid across v7x's 2 TCs.
            dimension_semantics=("parallel",),
        ),
    )(x_p, *flat_params)

    return out_padded[:B, :out_dim]


def make_params(key, input_size):
    """Deterministic parameter init (PyTorch Linear-like uniform bounds)."""
    dims = [input_size, 64, 128, 256, 256, 128, 64, 6]
    params = []
    for i in range(len(dims) - 1):
        fan_in, fan_out = dims[i], dims[i + 1]
        key, kw, kb = jax.random.split(key, 3)
        bound = 1.0 / jnp.sqrt(jnp.float32(fan_in))
        # stored as [in, out] (transpose of PyTorch's [out, in] layout)
        w = jax.random.uniform(kw, (fan_in, fan_out), jnp.float32, -bound, bound)
        b = jax.random.uniform(kb, (1, fan_out), jnp.float32, -bound, bound)
        params.append((w, b))
    return params


def mlp_reference(x, params):
    h = x
    for i, (w, b) in enumerate(params):
        h = h @ w + b
        if i < len(params) - 1:
            h = jnp.maximum(h, 0.0)
    return h


if __name__ == "__main__":
    key = jax.random.PRNGKey(0)
    k_in, k_params = jax.random.split(key)

    batch = 8
    input_size = 32
    x = jax.random.normal(k_in, (batch, input_size), jnp.float32)
    params = make_params(k_params, input_size)

    out = mlp_forward(x, params)
    out = jax.block_until_ready(out)

    ref = mlp_reference(x, params)
    assert out.shape == (batch, 6), out.shape
    # bf16 matmul operands with f32 accumulation -> loosened tolerance vs f32 ref.
    assert jnp.allclose(out, ref, atol=3e-2, rtol=3e-2), "mismatch vs reference"

    print("KERNEL_OK")
</pallas_src>

<mosaic_0001>
module attributes {stable_mosaic.version = 11 : i64} {
  func.func @mlp_kernel(%arg0: i32, %arg1: memref<8x32xbf16, #tpu.memory_space<vmem>>, %arg2: memref<32x128xbf16, #tpu.memory_space<vmem>>, %arg3: memref<1x128xf32, #tpu.memory_space<vmem>>, %arg4: memref<128x128xbf16, #tpu.memory_space<vmem>>, %arg5: memref<1x128xf32, #tpu.memory_space<vmem>>, %arg6: memref<128x256xbf16, #tpu.memory_space<vmem>>, %arg7: memref<1x256xf32, #tpu.memory_space<vmem>>, %arg8: memref<256x256xbf16, #tpu.memory_space<vmem>>, %arg9: memref<1x256xf32, #tpu.memory_space<vmem>>, %arg10: memref<256x128xbf16, #tpu.memory_space<vmem>>, %arg11: memref<1x128xf32, #tpu.memory_space<vmem>>, %arg12: memref<128x128xbf16, #tpu.memory_space<vmem>>, %arg13: memref<1x128xf32, #tpu.memory_space<vmem>>, %arg14: memref<128x128xbf16, #tpu.memory_space<vmem>>, %arg15: memref<1x128xf32, #tpu.memory_space<vmem>>, %arg16: memref<8x128xf32, #tpu.memory_space<vmem>>) attributes {dimension_semantics = [#tpu.dimension_semantics<parallel>], iteration_bounds = array<i64: 1>, scalar_prefetch = 0 : i64, scratch_operands = 0 : i64, tpu.core_type = #tpu.core_type<tc>, window_params = [{transform_indices = @transform_0, window_bounds = array<i64: 8, 32>}, {pipeline_mode = #tpu.pipeline_mode<synchronous>, transform_indices = @transform_1, window_bounds = array<i64: 32, 128>}, {pipeline_mode = #tpu.pipeline_mode<synchronous>, transform_indices = @transform_2, window_bounds = array<i64: 1, 128>}, {pipeline_mode = #tpu.pipeline_mode<synchronous>, transform_indices = @transform_3, window_bounds = array<i64: 128, 128>}, {pipeline_mode = #tpu.pipeline_mode<synchronous>, transform_indices = @transform_4, window_bounds = array<i64: 1, 128>}, {pipeline_mode = #tpu.pipeline_mode<synchronous>, transform_indices = @transform_5, window_bounds = array<i64: 128, 256>}, {pipeline_mode = #tpu.pipeline_mode<synchronous>, transform_indices = @transform_6, window_bounds = array<i64: 1, 256>}, {pipeline_mode = #tpu.pipeline_mode<synchronous>, transform_indices = @transform_7, window_bounds = array<i64: 256, 256>}, {pipeline_mode = #tpu.pipeline_mode<synchronous>, transform_indices = @transform_8, window_bounds = array<i64: 1, 256>}, {pipeline_mode = #tpu.pipeline_mode<synchronous>, transform_indices = @transform_9, window_bounds = array<i64: 256, 128>}, {pipeline_mode = #tpu.pipeline_mode<synchronous>, transform_indices = @transform_10, window_bounds = array<i64: 1, 128>}, {pipeline_mode = #tpu.pipeline_mode<synchronous>, transform_indices = @transform_11, window_bounds = array<i64: 128, 128>}, {pipeline_mode = #tpu.pipeline_mode<synchronous>, transform_indices = @transform_12, window_bounds = array<i64: 1, 128>}, {pipeline_mode = #tpu.pipeline_mode<synchronous>, transform_indices = @transform_13, window_bounds = array<i64: 128, 128>}, {pipeline_mode = #tpu.pipeline_mode<synchronous>, transform_indices = @transform_14, window_bounds = array<i64: 1, 128>}, {transform_indices = @transform_15, window_bounds = array<i64: 8, 128>}]} {
    %c0 = arith.constant 0 : index
    %c0_0 = arith.constant 0 : index
    %0 = vector.load %arg1[%c0, %c0_0] : memref<8x32xbf16, #tpu.memory_space<vmem>>, vector<8x32xbf16>
    %c0_1 = arith.constant 0 : index
    %c0_2 = arith.constant 0 : index
    %1 = vector.load %arg2[%c0_1, %c0_2] : memref<32x128xbf16, #tpu.memory_space<vmem>>, vector<32x128xbf16>
    %cst = arith.constant dense<0.000000e+00> : vector<8x128xf32>
    %2 = tpu.matmul %0, %1, %cst {dimension_numbers = #tpu.dot_dimension_numbers<[1], [0], [0], [1], [0, 0, 1, 1], [], []>} : vector<8x32xbf16>, vector<32x128xbf16>, vector<8x128xf32> -> vector<8x128xf32>
    %c0_3 = arith.constant 0 : index
    %c0_4 = arith.constant 0 : index
    %3 = vector.load %arg3[%c0_3, %c0_4] : memref<1x128xf32, #tpu.memory_space<vmem>>, vector<1x128xf32>
    %4 = vector.broadcast %3 : vector<1x128xf32> to vector<8x128xf32>
    %5 = arith.addf %2, %4 : vector<8x128xf32>
    %cst_5 = arith.constant 0.000000e+00 : f32
    %6 = vector.broadcast %cst_5 : f32 to vector<8x128xf32>
    %7 = arith.maximumf %5, %6 : vector<8x128xf32>
    %8 = arith.truncf %7 : vector<8x128xf32> to vector<8x128xbf16>
    %c0_6 = arith.constant 0 : index
    %c0_7 = arith.constant 0 : index
    %9 = vector.load %arg4[%c0_6, %c0_7] : memref<128x128xbf16, #tpu.memory_space<vmem>>, vector<128x128xbf16>
    %cst_8 = arith.constant dense<0.000000e+00> : vector<8x128xf32>
    %10 = tpu.matmul %8, %9, %cst_8 {dimension_numbers = #tpu.dot_dimension_numbers<[1], [0], [0], [1], [0, 0, 1, 1], [], []>} : vector<8x128xbf16>, vector<128x128xbf16>, vector<8x128xf32> -> vector<8x128xf32>
    %c0_9 = arith.constant 0 : index
    %c0_10 = arith.constant 0 : index
    %11 = vector.load %arg5[%c0_9, %c0_10] : memref<1x128xf32, #tpu.memory_space<vmem>>, vector<1x128xf32>
    %12 = vector.broadcast %11 : vector<1x128xf32> to vector<8x128xf32>
    %13 = arith.addf %10, %12 : vector<8x128xf32>
    %cst_11 = arith.constant 0.000000e+00 : f32
    %14 = vector.broadcast %cst_11 : f32 to vector<8x128xf32>
    %15 = arith.maximumf %13, %14 : vector<8x128xf32>
    %16 = arith.truncf %15 : vector<8x128xf32> to vector<8x128xbf16>
    %c0_12 = arith.constant 0 : index
    %c0_13 = arith.constant 0 : index
    %17 = vector.load %arg6[%c0_12, %c0_13] : memref<128x256xbf16, #tpu.memory_space<vmem>>, vector<128x256xbf16>
    %cst_14 = arith.constant dense<0.000000e+00> : vector<8x256xf32>
    %18 = tpu.matmul %16, %17, %cst_14 {dimension_numbers = #tpu.dot_dimension_numbers<[1], [0], [0], [1], [0, 0, 1, 1], [], []>} : vector<8x128xbf16>, vector<128x256xbf16>, vector<8x256xf32> -> vector<8x256xf32>
    %c0_15 = arith.constant 0 : index
    %c0_16 = arith.constant 0 : index
    %19 = vector.load %arg7[%c0_15, %c0_16] : memref<1x256xf32, #tpu.memory_space<vmem>>, vector<1x256xf32>
    %20 = vector.broadcast %19 : vector<1x256xf32> to vector<8x256xf32>
    %21 = arith.addf %18, %20 : vector<8x256xf32>
    %cst_17 = arith.constant 0.000000e+00 : f32
    %22 = vector.broadcast %cst_17 : f32 to vector<8x256xf32>
    %23 = arith.maximumf %21, %22 : vector<8x256xf32>
    %24 = arith.truncf %23 : vector<8x256xf32> to vector<8x256xbf16>
    %c0_18 = arith.constant 0 : index
    %c0_19 = arith.constant 0 : index
    %25 = vector.load %arg8[%c0_18, %c0_19] : memref<256x256xbf16, #tpu.memory_space<vmem>>, vector<256x256xbf16>
    %cst_20 = arith.constant dense<0.000000e+00> : vector<8x256xf32>
    %26 = tpu.matmul %24, %25, %cst_20 {dimension_numbers = #tpu.dot_dimension_numbers<[1], [0], [0], [1], [0, 0, 1, 1], [], []>} : vector<8x256xbf16>, vector<256x256xbf16>, vector<8x256xf32> -> vector<8x256xf32>
    %c0_21 = arith.constant 0 : index
    %c0_22 = arith.constant 0 : index
    %27 = vector.load %arg9[%c0_21, %c0_22] : memref<1x256xf32, #tpu.memory_space<vmem>>, vector<1x256xf32>
    %28 = vector.broadcast %27 : vector<1x256xf32> to vector<8x256xf32>
    %29 = arith.addf %26, %28 : vector<8x256xf32>
    %cst_23 = arith.constant 0.000000e+00 : f32
    %30 = vector.broadcast %cst_23 : f32 to vector<8x256xf32>
    %31 = arith.maximumf %29, %30 : vector<8x256xf32>
    %32 = arith.truncf %31 : vector<8x256xf32> to vector<8x256xbf16>
    %c0_24 = arith.constant 0 : index
    %c0_25 = arith.constant 0 : index
    %33 = vector.load %arg10[%c0_24, %c0_25] : memref<256x128xbf16, #tpu.memory_space<vmem>>, vector<256x128xbf16>
    %cst_26 = arith.constant dense<0.000000e+00> : vector<8x128xf32>
    %34 = tpu.matmul %32, %33, %cst_26 {dimension_numbers = #tpu.dot_dimension_numbers<[1], [0], [0], [1], [0, 0, 1, 1], [], []>} : vector<8x256xbf16>, vector<256x128xbf16>, vector<8x128xf32> -> vector<8x128xf32>
    %c0_27 = arith.constant 0 : index
    %c0_28 = arith.constant 0 : index
    %35 = vector.load %arg11[%c0_27, %c0_28] : memref<1x128xf32, #tpu.memory_space<vmem>>, vector<1x128xf32>
    %36 = vector.broadcast %35 : vector<1x128xf32> to vector<8x128xf32>
    %37 = arith.addf %34, %36 : vector<8x128xf32>
    %cst_29 = arith.constant 0.000000e+00 : f32
    %38 = vector.broadcast %cst_29 : f32 to vector<8x128xf32>
    %39 = arith.maximumf %37, %38 : vector<8x128xf32>
    %40 = arith.truncf %39 : vector<8x128xf32> to vector<8x128xbf16>
    %c0_30 = arith.constant 0 : index
    %c0_31 = arith.constant 0 : index
    %41 = vector.load %arg12[%c0_30, %c0_31] : memref<128x128xbf16, #tpu.memory_space<vmem>>, vector<128x128xbf16>
    %cst_32 = arith.constant dense<0.000000e+00> : vector<8x128xf32>
    %42 = tpu.matmul %40, %41, %cst_32 {dimension_numbers = #tpu.dot_dimension_numbers<[1], [0], [0], [1], [0, 0, 1, 1], [], []>} : vector<8x128xbf16>, vector<128x128xbf16>, vector<8x128xf32> -> vector<8x128xf32>
    %c0_33 = arith.constant 0 : index
    %c0_34 = arith.constant 0 : index
    %43 = vector.load %arg13[%c0_33, %c0_34] : memref<1x128xf32, #tpu.memory_space<vmem>>, vector<1x128xf32>
    %44 = vector.broadcast %43 : vector<1x128xf32> to vector<8x128xf32>
    %45 = arith.addf %42, %44 : vector<8x128xf32>
    %cst_35 = arith.constant 0.000000e+00 : f32
    %46 = vector.broadcast %cst_35 : f32 to vector<8x128xf32>
    %47 = arith.maximumf %45, %46 : vector<8x128xf32>
    %48 = arith.truncf %47 : vector<8x128xf32> to vector<8x128xbf16>
    %c0_36 = arith.constant 0 : index
    %c0_37 = arith.constant 0 : index
    %49 = vector.load %arg14[%c0_36, %c0_37] : memref<128x128xbf16, #tpu.memory_space<vmem>>, vector<128x128xbf16>
    %cst_38 = arith.constant dense<0.000000e+00> : vector<8x128xf32>
    %50 = tpu.matmul %48, %49, %cst_38 {dimension_numbers = #tpu.dot_dimension_numbers<[1], [0], [0], [1], [0, 0, 1, 1], [], []>} : vector<8x128xbf16>, vector<128x128xbf16>, vector<8x128xf32> -> vector<8x128xf32>
    %c0_39 = arith.constant 0 : index
    %c0_40 = arith.constant 0 : index
    %51 = vector.load %arg15[%c0_39, %c0_40] : memref<1x128xf32, #tpu.memory_space<vmem>>, vector<1x128xf32>
    %52 = vector.broadcast %51 : vector<1x128xf32> to vector<8x128xf32>
    %53 = arith.addf %50, %52 : vector<8x128xf32>
    %c0_41 = arith.constant 0 : index
    %c0_42 = arith.constant 0 : index
    %54 = vector.load %arg16[%c0_41, %c0_42] : memref<8x128xf32, #tpu.memory_space<vmem>>, vector<8x128xf32>
    tpu.vector_store %arg16[%c0_41, %c0_42], %53 {strides = array<i32>} : memref<8x128xf32, #tpu.memory_space<vmem>>, vector<8x128xf32>,
    return
  }
  func.func @transform_0(%arg0: i32) -> (i32, i32) {
    %c0_i32 = arith.constant 0 : i32
    %c0_i32_0 = arith.constant 0 : i32
    return %arg0, %c0_i32 : i32, i32
  }
  func.func @transform_1(%arg0: i32) -> (i32, i32) {
    %c0_i32 = arith.constant 0 : i32
    %c0_i32_0 = arith.constant 0 : i32
    %c0_i32_1 = arith.constant 0 : i32
    return %c0_i32, %c0_i32_0 : i32, i32
  }
  func.func @transform_2(%arg0: i32) -> (i32, i32) {
    %c0_i32 = arith.constant 0 : i32
    %c0_i32_0 = arith.constant 0 : i32
    %c0_i32_1 = arith.constant 0 : i32
    return %c0_i32, %c0_i32_0 : i32, i32
  }
  func.func @transform_3(%arg0: i32) -> (i32, i32) {
    %c0_i32 = arith.constant 0 : i32
    %c0_i32_0 = arith.constant 0 : i32
    %c0_i32_1 = arith.constant 0 : i32
    return %c0_i32, %c0_i32_0 : i32, i32
  }
  func.func @transform_4(%arg0: i32) -> (i32, i32) {
    %c0_i32 = arith.constant 0 : i32
    %c0_i32_0 = arith.constant 0 : i32
    %c0_i32_1 = arith.constant 0 : i32
    return %c0_i32, %c0_i32_0 : i32, i32
  }
  func.func @transform_5(%arg0: i32) -> (i32, i32) {
    %c0_i32 = arith.constant 0 : i32
    %c0_i32_0 = arith.constant 0 : i32
    %c0_i32_1 = arith.constant 0 : i32
    return %c0_i32, %c0_i32_0 : i32, i32
  }
  func.func @transform_6(%arg0: i32) -> (i32, i32) {
    %c0_i32 = arith.constant 0 : i32
    %c0_i32_0 = arith.constant 0 : i32
    %c0_i32_1 = arith.constant 0 : i32
    return %c0_i32, %c0_i32_0 : i32, i32
  }
  func.func @transform_7(%arg0: i32) -> (i32, i32) {
    %c0_i32 = arith.constant 0 : i32
    %c0_i32_0 = arith.constant 0 : i32
    %c0_i32_1 = arith.constant 0 : i32
    return %c0_i32, %c0_i32_0 : i32, i32
  }
  func.func @transform_8(%arg0: i32) -> (i32, i32) {
    %c0_i32 = arith.constant 0 : i32
    %c0_i32_0 = arith.constant 0 : i32
    %c0_i32_1 = arith.constant 0 : i32
    return %c0_i32, %c0_i32_0 : i32, i32
  }
  func.func @transform_9(%arg0: i32) -> (i32, i32) {
    %c0_i32 = arith.constant 0 : i32
    %c0_i32_0 = arith.constant 0 : i32
    %c0_i32_1 = arith.constant 0 : i32
    return %c0_i32, %c0_i32_0 : i32, i32
  }
  func.func @transform_10(%arg0: i32) -> (i32, i32) {
    %c0_i32 = arith.constant 0 : i32
    %c0_i32_0 = arith.constant 0 : i32
    %c0_i32_1 = arith.constant 0 : i32
    return %c0_i32, %c0_i32_0 : i32, i32
  }
  func.func @transform_11(%arg0: i32) -> (i32, i32) {
    %c0_i32 = arith.constant 0 : i32
    %c0_i32_0 = arith.constant 0 : i32
    %c0_i32_1 = arith.constant 0 : i32
    return %c0_i32, %c0_i32_0 : i32, i32
  }
  func.func @transform_12(%arg0: i32) -> (i32, i32) {
    %c0_i32 = arith.constant 0 : i32
    %c0_i32_0 = arith.constant 0 : i32
    %c0_i32_1 = arith.constant 0 : i32
    return %c0_i32, %c0_i32_0 : i32, i32
  }
  func.func @transform_13(%arg0: i32) -> (i32, i32) {
    %c0_i32 = arith.constant 0 : i32
    %c0_i32_0 = arith.constant 0 : i32
    %c0_i32_1 = arith.constant 0 : i32
    return %c0_i32, %c0_i32_0 : i32, i32
  }
  func.func @transform_14(%arg0: i32) -> (i32, i32) {
    %c0_i32 = arith.constant 0 : i32
    %c0_i32_0 = arith.constant 0 : i32
    %c0_i32_1 = arith.constant 0 : i32
    return %c0_i32, %c0_i32_0 : i32, i32
  }
  func.func @transform_15(%arg0: i32) -> (i32, i32) {
    %c0_i32 = arith.constant 0 : i32
    %c0_i32_0 = arith.constant 0 : i32
    return %arg0, %c0_i32 : i32, i32
  }
}

</mosaic_0001>

<bundles_post_ra>
// kernel: tpu_custom_call.1
= control target key start
LH: loop header
LB: loop body
LE: loop exit
PB: predicated region body
PF: predicated region fallthrough
CT: control target
= control target key end

     0   :  { %20 = vsyncpa [#allocation3], 0  ;;  %s2015_s0 = inlined_call_operand.hbm [shape: bf16[8,32], index: 0, kind: input, shape index: {}]   ;;  %s2016_s1 = inlined_call_operand.hbm [shape: bf16[32,128], index: 1, kind: input, shape index: {}]   ;;  %s2017_s2 = inlined_call_operand.vmem [shape: f32[1,128], index: 2, kind: input, shape index: {}]   ;;  %s2018_s3 = inlined_call_operand.hbm [shape: bf16[128,128], index: 3, kind: input, shape index: {}]   ;;  %s2019_s4 = inlined_call_operand.vmem [shape: f32[1,128], index: 4, kind: input, shape index: {}]   ;;  %s2020_s5 = inlined_call_operand.hbm [shape: bf16[128,256], index: 5, kind: input, shape index: {}]   ;;  %s2021_s6 = inlined_call_operand.vmem [shape: f32[1,256], index: 6, kind: input, shape index: {}]   ;;  %s2022_s7 = inlined_call_operand.hbm [shape: bf16[256,256], index: 7, kind: input, shape index: {}]   ;;  %s2023_s8 = inlined_call_operand.vmem [shape: f32[1,256], index: 8, kind: input, shape index: {}]   ;;  %s2024_s9 = inlined_call_operand.hbm [shape: bf16[256,128], index: 9, kind: input, shape index: {}]   ;;  %s2025_s10 = inlined_call_operand.vmem [shape: f32[1,128], index: 10, kind: input, shape index: {}]   ;;  %s2026_s11 = inlined_call_operand.hbm [shape: bf16[128,128], index: 11, kind: input, shape index: {}]   ;;  %s2027_s12 = inlined_call_operand.vmem [shape: f32[1,128], index: 12, kind: input, shape index: {}]   ;;  %s2028_s13 = inlined_call_operand.hbm [shape: bf16[128,128], index: 13, kind: input, shape index: {}]   ;;  %s2029_s14 = inlined_call_operand.vmem [shape: f32[1,128], index: 14, kind: input, shape index: {}]   ;;  %s2030_s15 = inlined_call_operand.hbm [shape: f32[8,128], index: 15, kind: output, shape index: {}]  }
   0x1   :  { %21 = vsyncpa [#allocation6], 0 }
   0x2   :  { %22 = vsyncpa [#allocation9], 0 }
   0x3   :  { %23 = vsyncpa [#allocation12], 0 }
   0x4   :  { %24 = vsyncpa [#allocation15], 0 }
   0x5   :  { %25 = vsyncpa [#allocation4], 0  ;;  %s1721_s18 = smov [#allocation5]   ;;  %s1511_s22 = scalar_lea.hbm %s2016_s1, 256 }
   0x6   :  { %s41_s19 = sshll.u32 %s1721_s18, 4  ;;  %p1512_p0 = scmp.ne.s32.totalorder %s2016_s1, %s1511_s22  ;;  %s42_s19 = int_to_ptr.vmem [resolvable:$true] %s41_s19 }
   0x7   :  { %p1515_p1 = scmp.lt.u32.totalorder %s1511_s22, %s2016_s1 }
   0x9   :  { %p1517_p2 = pnand %p1515_p1, %p1512_p0 }
   0xb   :  { %1520 = shalt.err (!%p1517_p2)
}
   0xc   :  { %s1521_s27 = scalar_lea.vmem %s42_s19, 256  ;;  %p1526_p4 = scmp.lt.s32.totalorder %s42_s19, %s42_s19 }
   0xd   :  { %p1522_p3 = scmp.ne.s32.totalorder %s42_s19, %s1521_s27  ;;  %p1527_p5 = scmp.lt.s32.totalorder %s1521_s27, %s1521_s27 }
   0xf   :  { %p1528_p6 = por %p1527_p5, %p1526_p4 }
  0x11   :  { %p1529_p7 = pnand %p1528_p6, %p1522_p3 }
  0x13   :  { %1532 = shalt.err (!%p1529_p7)
}
  0x14   :  { %s2031_s28 = smov 64   ;;  %s2033_s29 = smov 4  }
  0x15   :  { %47 = dma.hbm_to_vmem [thread:$0]  %s2016_s1, 256, %s42_s19, [#allocation6], %s2031_s28, %s2031_s28, %s2033_s29  }
  0x16   :  { %s1724_s17 = smov [#allocation8]   ;;  %s1533_s22 = scalar_lea.hbm %s2020_s5, 2048 }
  0x17   :  { %s69_s18 = sshll.u32 %s1724_s17, 4  ;;  %p1534_p8 = scmp.ne.s32.totalorder %s2020_s5, %s1533_s22  ;;  %s70_s18 = int_to_ptr.vmem [resolvable:$true] %s69_s18 }
  0x18   :  { %p1537_p9 = scmp.lt.u32.totalorder %s1533_s22, %s2020_s5 }
  0x1a   :  { %p1539_p10 = pnand %p1537_p9, %p1534_p8 }
  0x1c   :  { %1542 = shalt.err (!%p1539_p10)
}
  0x1d   :  { %s1543_s27 = scalar_lea.vmem %s70_s18, 2048  ;;  %p1548_p12 = scmp.lt.s32.totalorder %s70_s18, %s70_s18 }
  0x1e   :  { %p1544_p11 = scmp.ne.s32.totalorder %s70_s18, %s1543_s27  ;;  %p1549_p13 = scmp.lt.s32.totalorder %s1543_s27, %s1543_s27 }
  0x20   :  { %p1550_p0 = por %p1549_p13, %p1548_p12 }
  0x22   :  { %p1551_p1 = pnand %p1550_p0, %p1544_p11 }
  0x24   :  { %1554 = shalt.err (!%p1551_p1)
}
  0x25   :  { %s1725_s1 = smov 128   ;;  %s1726_s19 = smov 8  }
  0x26   :  { %75 = dma.hbm_to_vmem [thread:$0]  %s2020_s5, 2048, %s70_s18, [#allocation9], %s1725_s1, %s1725_s1, %s1726_s19  }
  0x27   :  { %s1727_s17 = smov [#allocation11]   ;;  %s1728_s21 = smov [#allocation2]  }
  0x28   :  { %s97_s20 = sshll.u32 %s1727_s17, 4  ;;  %s32_s22 = sshll.u32 %s1728_s21, 4  ;;  %s98_s20 = int_to_ptr.vmem [resolvable:$true] %s97_s20  ;;  %s33_s22 = int_to_ptr.vmem [resolvable:$true] %s32_s22 }
  0x29   :  { %s1555_s25 = scalar_lea.hbm %s2024_s9, 2048 }
  0x2a   :  { %p1556_p2 = scmp.ne.s32.totalorder %s2024_s9, %s1555_s25  ;;  %p1559_p3 = scmp.lt.u32.totalorder %s1555_s25, %s2024_s9 }
  0x2c   :  { %p1561_p4 = pnand %p1559_p3, %p1556_p2 }
  0x2e   :  { %1564 = shalt.err (!%p1561_p4)
}
  0x2f   :  { %s1565_s5 = scalar_lea.vmem %s98_s20, 2048  ;;  %p1570_p6 = scmp.lt.s32.totalorder %s98_s20, %s98_s20 }
  0x30   :  { %p1566_p5 = scmp.ne.s32.totalorder %s98_s20, %s1565_s5  ;;  %p1571_p7 = scmp.lt.s32.totalorder %s1565_s5, %s1565_s5 }
  0x32   :  { %p1572_p8 = por %p1571_p7, %p1570_p6 }
  0x34   :  { %p1573_p9 = pnand %p1572_p8, %p1566_p5 }
  0x36   :  { %1576 = shalt.err (!%p1573_p9)
}
  0x37   :  { %s2035_s18 = smov 4   ;;  %s2036_s30 = smov 64  }
  0x38   :  { %103 = dma.hbm_to_vmem [thread:$0]  %s2024_s9, 2048, %s98_s20, [#allocation12], %s2036_s30, %s2036_s30, %s2035_s18  }
  0x39   :  { %s1577_s28 = scalar_lea.hbm %s2015_s0, 64 }
  0x3a   :  { %p1578_p10 = scmp.ne.s32.totalorder %s2015_s0, %s1577_s28  ;;  %p1581_p11 = scmp.lt.u32.totalorder %s1577_s28, %s2015_s0 }
  0x3c   :  { %p1583_p12 = pnand %p1581_p11, %p1578_p10 }
  0x3e   :  { %1586 = shalt.err (!%p1583_p12)
}
  0x3f   :  { %s1587_s27 = scalar_lea.vmem %s33_s22, 64  ;;  %p1592_p0 = scmp.lt.s32.totalorder %s33_s22, %s33_s22 }
  0x40   :  { %p1588_p13 = scmp.ne.s32.totalorder %s33_s22, %s1587_s27  ;;  %p1593_p1 = scmp.lt.s32.totalorder %s1587_s27, %s1587_s27 }
  0x42   :  { %p1594_p2 = por %p1593_p1, %p1592_p0 }
  0x44   :  { %p1595_p3 = pnand %p1594_p2, %p1588_p13 }
  0x46   :  { %1598 = shalt.err (!%p1595_p3)
}
  0x47   :  { %35 = dma.hbm_to_vmem [thread:$0]  %s2015_s0, 64, %s33_s22, [#allocation3]  }
  0x48   :  { %s1729_s5 = smov [#allocation7]   ;;  %s1730_s17 = smov [#allocation10]  }
  0x49   :  { %s55_s16 = sshll.u32 %s1729_s5, 4  ;;  %s83_s21 = sshll.u32 %s1730_s17, 4  ;;  %s56_s16 = int_to_ptr.vmem [resolvable:$true] %s55_s16  ;;  %s1874_s21 = int_to_ptr.vmem [resolvable:$true] %s83_s21 }
  0x4a   :  { %s1599_s29 = scalar_lea.hbm %s2018_s3, 1024 }
  0x4b   :  { %p1600_p4 = scmp.ne.s32.totalorder %s2018_s3, %s1599_s29  ;;  %p1603_p5 = scmp.lt.u32.totalorder %s1599_s29, %s2018_s3 }
  0x4d   :  { %p1605_p6 = pnand %p1603_p5, %p1600_p4 }
  0x4f   :  { %1608 = shalt.err (!%p1605_p6)
}
  0x50   :  { %s1609_s0 = scalar_lea.vmem %s56_s16, 1024  ;;  %p1614_p8 = scmp.lt.s32.totalorder %s56_s16, %s56_s16 }
  0x51   :  { %p1610_p7 = scmp.ne.s32.totalorder %s56_s16, %s1609_s0  ;;  %p1615_p9 = scmp.lt.s32.totalorder %s1609_s0, %s1609_s0 }
  0x53   :  { %p1616_p10 = por %p1615_p9, %p1614_p8 }
  0x55   :  { %p1617_p11 = pnand %p1616_p10, %p1610_p7 }
  0x57   :  { %1620 = shalt.err (!%p1617_p11)
}
  0x58   :  { %61 = dma.hbm_to_vmem [thread:$0]  %s2018_s3, 1024, %s56_s16, [#allocation6], %s2036_s30, %s2036_s30, %s2035_s18  }
  0x59   :  { %s1621_s17 = scalar_lea.hbm %s2022_s7, 4096 }
  0x5a   :  { %p1622_p12 = scmp.ne.s32.totalorder %s2022_s7, %s1621_s17  ;;  %p1625_p13 = scmp.lt.u32.totalorder %s1621_s17, %s2022_s7 }
  0x5c   :  { %p1627_p0 = pnand %p1625_p13, %p1622_p12 }
  0x5e   :  { %1630 = shalt.err (!%p1627_p0)
}
  0x5f   :  { %s1631_s25 = scalar_lea.vmem %s1874_s21, 4096  ;;  %p1636_p2 = scmp.lt.s32.totalorder %s1874_s21, %s1874_s21 }
  0x60   :  { %p1632_p1 = scmp.ne.s32.totalorder %s1874_s21, %s1631_s25  ;;  %p1637_p3 = scmp.lt.s32.totalorder %s1631_s25, %s1631_s25 }
  0x62   :  { %p1638_p4 = por %p1637_p3, %p1636_p2 }
  0x64   :  { %p1639_p5 = pnand %p1638_p4, %p1632_p1 }
  0x66   :  { %1642 = shalt.err (!%p1639_p5)
}
  0x67   :  { %89 = dma.hbm_to_vmem [thread:$0]  %s2022_s7, 4096, %s1874_s21, [#allocation9], %s1725_s1, %s1725_s1, %s1726_s19  }
  0x68   :  { %s1731_s26 = smov [#allocation13]   ;;  %s1732_s0 = smov [#allocation14]  }
  0x69   :  { %s111_s27 = sshll.u32 %s1731_s26, 4  ;;  %s125_s22 = sshll.u32 %s1732_s0, 4  ;;  %s112_s27 = int_to_ptr.vmem [resolvable:$true] %s111_s27  ;;  %s1911_s22 = int_to_ptr.vmem [resolvable:$true] %s125_s22 }
  0x6a   :  { %s1643_s5 = scalar_lea.hbm %s2026_s11, 1024 }
  0x6b   :  { %p1644_p6 = scmp.ne.s32.totalorder %s2026_s11, %s1643_s5  ;;  %p1647_p7 = scmp.lt.u32.totalorder %s1643_s5, %s2026_s11 }
  0x6d   :  { %p1649_p8 = pnand %p1647_p7, %p1644_p6 }
  0x6f   :  { %1652 = shalt.err (!%p1649_p8)
}
  0x70   :  { %s1653_s7 = scalar_lea.vmem %s112_s27, 1024  ;;  %p1658_p10 = scmp.lt.s32.totalorder %s112_s27, %s112_s27 }
  0x71   :  { %p1654_p9 = scmp.ne.s32.totalorder %s112_s27, %s1653_s7  ;;  %p1659_p11 = scmp.lt.s32.totalorder %s1653_s7, %s1653_s7 }
  0x73   :  { %p1660_p12 = por %p1659_p11, %p1658_p10 }
  0x75   :  { %p1661_p13 = pnand %p1660_p12, %p1654_p9 }
  0x77   :  { %1664 = shalt.err (!%p1661_p13)
}
  0x78   :  { %117 = dma.hbm_to_vmem [thread:$0]  %s2026_s11, 1024, %s112_s27, [#allocation12], %s2036_s30, %s2036_s30, %s2035_s18  }
  0x79   :  { %s1665_s25 = scalar_lea.hbm %s2028_s13, 1024 }
  0x7a   :  { %p1666_p0 = scmp.ne.s32.totalorder %s2028_s13, %s1665_s25  ;;  %p1669_p1 = scmp.lt.u32.totalorder %s1665_s25, %s2028_s13 }
  0x7c   :  { %p1671_p2 = pnand %p1669_p1, %p1666_p0 }
  0x7e   :  { %1674 = shalt.err (!%p1671_p2)
}
  0x7f   :  { %s1675_s9 = scalar_lea.vmem %s1911_s22, 1024  ;;  %p1680_p4 = scmp.lt.s32.totalorder %s1911_s22, %s1911_s22 }
  0x80   :  { %p1676_p3 = scmp.ne.s32.totalorder %s1911_s22, %s1675_s9  ;;  %p1681_p5 = scmp.lt.s32.totalorder %s1675_s9, %s1675_s9 }
  0x82   :  { %p1682_p6 = por %p1681_p5, %p1680_p4 }
  0x84   :  { %p1683_p7 = pnand %p1682_p6, %p1676_p3 }
  0x86   :  { %1686 = shalt.err (!%p1683_p7)
}
  0x87   :  { %131 = dma.hbm_to_vmem [thread:$0]  %s2028_s13, 1024, %s1911_s22, [#allocation15], %s2036_s30, %s2036_s30, %s2035_s18  }
  0x88   :  { %1709 = dma.done.wait [#allocation3], 64  }
  0x89   :  { %1710 = vsyncadd [#allocation3], 4294967232 }
  0x8a   :  { %1711 = dma.done.wait [#allocation6], 1280  }
  0x8b   :  { %1712 = vsyncadd [#allocation6], 4294966016 }
  0x8c   :  { %1713 = dma.done.wait [#allocation9], 6144  }
  0x8d   :  { %1714 = vsyncadd [#allocation9], 4294961152 }
  0x8e   :  { %1715 = dma.done.wait [#allocation12], 3072  }
  0x8f   :  { %1716 = vsyncadd [#allocation12], 4294964224 }
  0x90   :  { %1717 = dma.done.wait [#allocation15], 1024  }
  0x91   :  { %1718 = vsyncadd [#allocation15], 4294966272  ;;  %v1733_v0 = vmov 0.0   ;;  %vm1734_vm0 = vmmov 0   ;;  %v1397_v1 = vld [vmem:[#allocation5] sm:$0xff]   ;;  %v1398_v2 = vld [vmem:[#allocation5 + $0x8] sm:$0xff]  }
  0x92   :  { %1313 = vmatprep.subr.bf16.mxu0 %v1733_v0  ;;  %1317 = vmatprep.mubr.msk.bf16.mxu0 %vm1734_vm0, %v1733_v0  ;;  %v1399_v3 = vld [vmem:[#allocation7] sm:$0xff]   ;;  %vm183_vm1 = vcmask 261120   ;;  %v1400_v4 = vld [vmem:[#allocation7 + $0x8] sm:$0xff]   ;;  %v1401_v6 = vld [vmem:[#allocation7 + $0x10] sm:$0xff]   ;;  %v1735_v36 = vmov 0   ;;  %s1736_s29 = smov [#allocation16]  }
  0x93   :  { %1321 = vmatprep.subr.bf16.mxu1 %v1733_v0  ;;  %1337 = vmatprep.mubr.msk.bf16.mxu1 %vm1734_vm0, %v1733_v0  ;;  %v159_v5 = vld [vmem:[#allocation2] sm:$0xf]  ;;  %v1402_v7 = vld [vmem:[#allocation7 + $0x18] sm:$0xff]   ;;  %v1403_v8 = vld [vmem:[#allocation7 + $0x20] sm:$0xff]   ;;  %s1152_s7 = sshll.u32 %s1736_s29, 4  ;;  %s1153_s7 = int_to_ptr.vmem [resolvable:$true] %s1152_s7 }
  0x94   :  { %1314 = vmatpush3.bf16.msra.mxu0 %v1397_v1  ;;  %1322 = vmatpush3.bf16.msra.mxu1 %v1399_v3  ;;  %v1404_v9 = vld [vmem:[#allocation7 + $0x28] sm:$0xff]   ;;  %v1405_v10 = vld [vmem:[#allocation7 + $0x30] sm:$0xff]   ;;  %v1406_v11 = vld [vmem:[#allocation7 + $0x38] sm:$0xff]   ;;  %p1692_p9 = scmp.lt.s32.totalorder %s1153_s7, %s1153_s7 }
  0x95   :  { %1315 = vmatprep.subr.bf16.mxu0 %v1733_v0  ;;  %1323 = vmatprep.subr.bf16.mxu1 %v1733_v0  ;;  %v1407_v12 = vld [vmem:[#allocation8] ss:$8 sps:$4 sm:$0xff]   ;;  %v1409_v13 = vld [vmem:[#allocation8 + $0x4] ss:$8 sps:$4 sm:$0xff]   ;;  %v1412_v14 = vld [vmem:[#allocation8 + $0x14] ss:$8 sps:$4 sm:$0xff]  }
  0x96   :  { %v1410_v15 = vld [vmem:[#allocation8 + $0x10] ss:$8 sps:$4 sm:$0xff]   ;;  %v1415_v16 = vld [vmem:[#allocation8 + $0x24] ss:$8 sps:$4 sm:$0xff]   ;;  %v1413_v17 = vld [vmem:[#allocation8 + $0x20] ss:$8 sps:$4 sm:$0xff]  }
  0x97   :  { %v1418_v18 = vld [vmem:[#allocation8 + $0x34] ss:$8 sps:$4 sm:$0xff]   ;;  %v1416_v19 = vld [vmem:[#allocation8 + $0x30] ss:$8 sps:$4 sm:$0xff]   ;;  %v1421_v20 = vld [vmem:[#allocation8 + $0x44] ss:$8 sps:$4 sm:$0xff]  }
  0x98   :  { %1316 = vmatpush3.bf16.msra.mxu0 %v1398_v2  ;;  %1324 = vmatpush3.bf16.msra.mxu1 %v1400_v4  ;;  %v1419_v21 = vld [vmem:[#allocation8 + $0x40] ss:$8 sps:$4 sm:$0xff]   ;;  %v1424_v22 = vld [vmem:[#allocation8 + $0x54] ss:$8 sps:$4 sm:$0xff]   ;;  %v1422_v23 = vld [vmem:[#allocation8 + $0x50] ss:$8 sps:$4 sm:$0xff]  }
  0x99   :  { %1325 = vmatprep.subr.bf16.mxu1 %v1733_v0  ;;  %450 = vmatprep.subr.bf16.mxu0 %v1409_v13  ;;  %v1427_v24 = vld [vmem:[#allocation8 + $0x64] ss:$8 sps:$4 sm:$0xff]   ;;  %v1425_v25 = vld [vmem:[#allocation8 + $0x60] ss:$8 sps:$4 sm:$0xff]   ;;  %v1430_v34 = vld [vmem:[#allocation8 + $0x74] ss:$8 sps:$4 sm:$0xff]  }
  0x9a   :  { %v1165_v26 = vld [vmem:[%s2017_s2] ss:$0 sm:$0xff]  ;;  %v1428_v35 = vld [vmem:[#allocation8 + $0x70] ss:$8 sps:$4 sm:$0xff]   ;;  %v1431_v37 = vld [vmem:[#allocation10] ss:$8 sps:$4 sm:$0xff]  }
  0x9b   :  { %1318 = vmatmul.mubr.msk.bf16.vlgmr.msra.gmra.mrb[0].mxu0 %vm183_vm1, %v159_v5  ;;  %v1433_v38 = vld [vmem:[#allocation10 + $0x4] ss:$8 sps:$4 sm:$0xff]   ;;  %v1436_v39 = vld [vmem:[#allocation10 + $0x14] ss:$8 sps:$4 sm:$0xff]   ;;  %v1434_v40 = vld [vmem:[#allocation10 + $0x10] ss:$8 sps:$4 sm:$0xff]  }
  0x9c   :  { %1326 = vmatpush3.bf16.msra.mxu1 %v1401_v6  ;;  %451 = vmatpush1.bf16.msra.mxu0 %v1407_v12  ;;  %v1439_v41 = vld [vmem:[#allocation10 + $0x24] ss:$8 sps:$4 sm:$0xff]   ;;  %v1437_v42 = vld [vmem:[#allocation10 + $0x20] ss:$8 sps:$4 sm:$0xff]   ;;  %v1442_v43 = vld [vmem:[#allocation10 + $0x34] ss:$8 sps:$4 sm:$0xff]  }
  0x9d   :  { %1327 = vmatprep.subr.bf16.mxu1 %v1733_v0  ;;  %452 = vmatprep.subr.bf16.mxu0 %v1412_v14  ;;  %v1440_v44 = vld [vmem:[#allocation10 + $0x30] ss:$8 sps:$4 sm:$0xff]   ;;  %v1445_v45 = vld [vmem:[#allocation10 + $0x44] ss:$8 sps:$4 sm:$0xff]   ;;  %v1443_v46 = vld [vmem:[#allocation10 + $0x40] ss:$8 sps:$4 sm:$0xff]  }
  0x9e   :  { %482 = vmatprep.mubr.bf16.mxu0 %v1735_v36  ;;  %v1448_v47 = vld [vmem:[#allocation10 + $0x54] ss:$8 sps:$4 sm:$0xff]   ;;  %v1446_v48 = vld [vmem:[#allocation10 + $0x50] ss:$8 sps:$4 sm:$0xff]   ;;  %v1451_v49 = vld [vmem:[#allocation10 + $0x64] ss:$8 sps:$4 sm:$0xff]  }
  0x9f   :  { %v1449_v50 = vld [vmem:[#allocation10 + $0x60] ss:$8 sps:$4 sm:$0xff]   ;;  %v1454_v51 = vld [vmem:[#allocation10 + $0x74] ss:$8 sps:$4 sm:$0xff]   ;;  %v1452_v52 = vld [vmem:[#allocation10 + $0x70] ss:$8 sps:$4 sm:$0xff]  }
  0xa0   :  { %1328 = vmatpush3.bf16.msra.mxu1 %v1402_v7  ;;  %453 = vmatpush1.bf16.msra.mxu0 %v1410_v15  ;;  %v1457_v53 = vld [vmem:[#allocation10 + $0x84] ss:$8 sps:$4 sm:$0xff]   ;;  %v1455_v54 = vld [vmem:[#allocation10 + $0x80] ss:$8 sps:$4 sm:$0xff]   ;;  %v1460_v55 = vld [vmem:[#allocation10 + $0x94] ss:$8 sps:$4 sm:$0xff]  }
  0xa1   :  { %1329 = vmatprep.subr.bf16.mxu1 %v1733_v0  ;;  %454 = vmatprep.subr.bf16.mxu0 %v1415_v16  ;;  %v1458_v56 = vld [vmem:[#allocation10 + $0x90] ss:$8 sps:$4 sm:$0xff]   ;;  %v1463_v57 = vld [vmem:[#allocation10 + $0xa4] ss:$8 sps:$4 sm:$0xff]   ;;  %v1461_v58 = vld [vmem:[#allocation10 + $0xa0] ss:$8 sps:$4 sm:$0xff]  }
  0xa2   :  { %v1466_v59 = vld [vmem:[#allocation10 + $0xb4] ss:$8 sps:$4 sm:$0xff]   ;;  %v1464_v60 = vld [vmem:[#allocation10 + $0xb0] ss:$8 sps:$4 sm:$0xff]   ;;  %v1469_v61 = vld [vmem:[#allocation10 + $0xc4] ss:$8 sps:$4 sm:$0xff]  }
  0xa3   :  { %v1467_v62 = vld [vmem:[#allocation10 + $0xc0] ss:$8 sps:$4 sm:$0xff]   ;;  %v1472_v63 = vld [vmem:[#allocation10 + $0xd4] ss:$8 sps:$4 sm:$0xff]   ;;  %v1470_v1 = vld [vmem:[#allocation10 + $0xd0] ss:$8 sps:$4 sm:$0xff]  }
  0xa4   :  { %1330 = vmatpush3.bf16.msra.mxu1 %v1403_v8  ;;  %455 = vmatpush1.bf16.msra.mxu0 %v1413_v17  ;;  %v1169_v2 = vld [vmem:[%s2019_s4] ss:$0 sm:$0xff]  ;;  %v1478_v12 = vld [vmem:[#allocation10 + $0xf4] ss:$8 sps:$4 sm:$0xff]   ;;  %v1476_v13 = vld [vmem:[#allocation10 + $0xf0] ss:$8 sps:$4 sm:$0xff]  }
  0xa5   :  { %1331 = vmatprep.subr.bf16.mxu1 %v1733_v0  ;;  %456 = vmatprep.subr.bf16.mxu0 %v1418_v18  ;;  %v1479_v14 = vld [vmem:[#allocation11 + $0x40] sm:$0xff]   ;;  %v1481_v16 = vld [vmem:[#allocation11 + $0x48] sm:$0xff]   ;;  %v1483_v18 = vld [vmem:[#allocation11 + $0x50] sm:$0xff]  }
  0xa6   :  { %v1480_v15 = vld [vmem:[#allocation11] sm:$0xff]   ;;  %v1482_v17 = vld [vmem:[#allocation11 + $0x8] sm:$0xff]  }
  0xa8   :  { %1332 = vmatpush3.bf16.msra.mxu1 %v1404_v9  ;;  %457 = vmatpush1.bf16.msra.mxu0 %v1416_v19  ;;  %v1484_v19 = vld [vmem:[#allocation11 + $0x10] sm:$0xff]  }
  0xa9   :  { %1333 = vmatprep.subr.bf16.mxu1 %v1733_v0  ;;  %458 = vmatprep.subr.bf16.mxu0 %v1421_v20  ;;  %v1485_v20 = vld [vmem:[#allocation11 + $0x58] sm:$0xff]  }
  0xac   :  { %1334 = vmatpush3.bf16.msra.mxu1 %v1405_v10  ;;  %459 = vmatpush1.bf16.msra.mxu0 %v1419_v21  ;;  %v1475_v10 = vld [vmem:[#allocation10 + $0xe4] ss:$8 sps:$4 sm:$0xff]   ;;  %v1486_v21 = vld [vmem:[#allocation11 + $0x18] sm:$0xff]  }
  0xad   :  { %1335 = vmatprep.subr.bf16.mxu1 %v1733_v0  ;;  %460 = vmatprep.subr.bf16.mxu0 %v1424_v22  ;;  %v1487_v22 = vld [vmem:[#allocation11 + $0x60] sm:$0xff]  }
  0xb0   :  { %1336 = vmatpush3.bf16.msra.mxu1 %v1406_v11  ;;  %461 = vmatpush1.bf16.msra.mxu0 %v1422_v23  ;;  %v1473_v11 = vld [vmem:[#allocation10 + $0xe0] ss:$8 sps:$4 sm:$0xff]  }
  0xb1   :  { %462 = vmatprep.subr.bf16.mxu0 %v1427_v24  ;;  %699 = vmatprep.subr.bf16.mxu1 %v1433_v38  ;;  %v1488_v23 = vld [vmem:[#allocation11 + $0x20] sm:$0xff]   ;;  %v1489_v24 = vld [vmem:[#allocation11 + $0x68] sm:$0xff]  }
  0xb4   :  { %463 = vmatpush1.bf16.msra.mxu0 %v1425_v25  ;;  %v1490_v25 = vld [vmem:[#allocation11 + $0x28] sm:$0xff]  }
  0xb5   :  { %464 = vmatprep.subr.bf16.mxu0 %v1430_v34 }
  0xb8   :  { %465 = vmatpush1.bf16.msra.mxu0 %v1428_v35 }
  0xb9   :  { %1273 = vmatprep.subr.bf16.mxu0 %v1479_v14 }
 0x16e   :  { %v221_v27 = vpop.f32.mrb[0].mxu0 }
 0x16f   :  { %v222_v28 = vadd.f32 %v1165_v26, %v221_v27  ;;  %v1319_v29 = vpop.f32.mrb[1].mxu0  ;;  %v360_v26 = vlaneseq }
 0x170   :  { %v224_v30 = vpop.f32.mrb[2].mxu0  ;;  %v358_v29 = vld [vmem:[%s2021_s6] sm:$0x3] }
 0x171   :  { %v227_v31 = vmax.f32 %v222_v28, 0.0  ;;  %v1320_v32 = vpop.f32.mrb[3].mxu0  ;;  %v361_v27 = vshrl.u32 %v360_v26, 7 }
 0x173   :  { %v228_v33 = vpack.c.bf16 %v227_v31, %v227_v31  ;;  %v362_v28 = vsub.s32 0, %v361_v27  ;;  %v366_v30 = vsub.s32 1, %v361_v27 }
 0x175   :  { %1338 = vmatmul.mubr.bf16.vlgmr.msra.gmra.mrb[0].mxu1 %v228_v33  ;;  %v363_v31 = vrot.slane %v358_v29, %v362_v28  ;;  %v367_v32 = vrot.slane %v358_v29, %v366_v30 }
 0x176   :  { %700 = vmatpush1.bf16.msra.mxu1 %v1431_v37 }
 0x177   :  { %701 = vmatprep.subr.bf16.mxu1 %v1436_v39 }
 0x17a   :  { %702 = vmatpush1.bf16.msra.mxu1 %v1434_v40 }
 0x17b   :  { %703 = vmatprep.subr.bf16.mxu1 %v1439_v41 }
 0x17e   :  { %704 = vmatpush1.bf16.msra.mxu1 %v1437_v42 }
 0x17f   :  { %705 = vmatprep.subr.bf16.mxu1 %v1442_v43  ;;  %v1491_v43 = vld [vmem:[#allocation11 + $0x70] sm:$0xff]  }
 0x182   :  { %706 = vmatpush1.bf16.msra.mxu1 %v1440_v44  ;;  %v1492_v44 = vld [vmem:[#allocation11 + $0x30] sm:$0xff]  }
 0x183   :  { %707 = vmatprep.subr.bf16.mxu1 %v1445_v45  ;;  %v1493_v45 = vld [vmem:[#allocation11 + $0x78] sm:$0xff]  }
 0x186   :  { %708 = vmatpush1.bf16.msra.mxu1 %v1443_v46  ;;  %v1494_v46 = vld [vmem:[#allocation11 + $0x38] sm:$0xff]  }
 0x187   :  { %709 = vmatprep.subr.bf16.mxu1 %v1448_v47  ;;  %v527_v47 = vld [vmem:[%s2023_s8] sm:$0x3] }
 0x18a   :  { %710 = vmatpush1.bf16.msra.mxu1 %v1446_v48  ;;  %v532_v48 = vrot.slane %v527_v47, %v362_v28 }
 0x18b   :  { %711 = vmatprep.subr.bf16.mxu1 %v1451_v49  ;;  %v536_v49 = vrot.slane %v527_v47, %v366_v30  ;;  %v1252_v30 = vld [vmem:[%s2029_s14] ss:$0 sm:$0xff] }
 0x18e   :  { %712 = vmatpush1.bf16.msra.mxu1 %v1449_v50 }
 0x18f   :  { %713 = vmatprep.subr.bf16.mxu1 %v1454_v51 }
 0x192   :  { %714 = vmatpush1.bf16.msra.mxu1 %v1452_v52 }
 0x193   :  { %715 = vmatprep.subr.bf16.mxu1 %v1457_v53 }
 0x196   :  { %716 = vmatpush1.bf16.msra.mxu1 %v1455_v54 }
 0x197   :  { %717 = vmatprep.subr.bf16.mxu1 %v1460_v55 }
 0x19a   :  { %718 = vmatpush1.bf16.msra.mxu1 %v1458_v56 }
 0x19b   :  { %719 = vmatprep.subr.bf16.mxu1 %v1463_v57 }
 0x19e   :  { %720 = vmatpush1.bf16.msra.mxu1 %v1461_v58 }
 0x19f   :  { %721 = vmatprep.subr.bf16.mxu1 %v1466_v59  ;;  %v1495_v59 = vld [vmem:[#allocation13] sm:$0xff]  }
 0x1a2   :  { %722 = vmatpush1.bf16.msra.mxu1 %v1464_v60 }
 0x1a3   :  { %723 = vmatprep.subr.bf16.mxu1 %v1469_v61  ;;  %v1496_v61 = vld [vmem:[#allocation13 + $0x8] sm:$0xff]  }
 0x1a6   :  { %724 = vmatpush1.bf16.msra.mxu1 %v1467_v62  ;;  %v1497_v62 = vld [vmem:[#allocation13 + $0x10] sm:$0xff]  }
 0x1a7   :  { %725 = vmatprep.subr.bf16.mxu1 %v1472_v63  ;;  %v1498_v63 = vld [vmem:[#allocation13 + $0x18] sm:$0xff]  }
 0x1aa   :  { %726 = vmatpush1.bf16.msra.mxu1 %v1470_v1  ;;  %v1499_v1 = vld [vmem:[#allocation13 + $0x20] sm:$0xff]  }
 0x1ab   :  { %727 = vmatprep.subr.bf16.mxu1 %v1475_v10  ;;  %v1508_v10 = vld [vmem:[#allocation14 + $0x28] sm:$0xff]  }
 0x1ae   :  { %728 = vmatpush1.bf16.msra.mxu1 %v1473_v11 }
 0x1af   :  { %729 = vmatprep.subr.bf16.mxu1 %v1478_v12  ;;  %v1226_v12 = vld [vmem:[%s2025_s10] ss:$0 sm:$0xff] }
 0x1b2   :  { %730 = vmatpush1.bf16.msra.mxu1 %v1476_v13 }
 0x1b3   :  { %1361 = vmatprep.subr.bf16.mxu1 %v1733_v0 }
 0x248   :  { %v334_v3 = vpop.f32.mrb[0].mxu1 }
 0x249   :  { %v335_v4 = vadd.f32 %v1169_v2, %v334_v3  ;;  %v1339_v5 = vpop.f32.mrb[1].mxu1  ;;  %v1500_v2 = vld [vmem:[#allocation13 + $0x28] sm:$0xff]   ;;  %v1501_v3 = vld [vmem:[#allocation13 + $0x30] sm:$0xff]  }
 0x24a   :  { %v337_v6 = vpop.f32.mrb[2].mxu1  ;;  %v1503_v5 = vld [vmem:[#allocation14] sm:$0xff]  }
 0x24b   :  { %v340_v7 = vmax.f32 %v335_v4, 0.0  ;;  %v1340_v8 = vpop.f32.mrb[3].mxu1  ;;  %v1502_v4 = vld [vmem:[#allocation13 + $0x38] sm:$0xff]   ;;  %v1504_v6 = vld [vmem:[#allocation14 + $0x8] sm:$0xff]  }
 0x24c   :  { %v1506_v8 = vld [vmem:[#allocation14 + $0x18] sm:$0xff]  }
 0x24d   :  { %v341_v9 = vpack.c.bf16 %v340_v7, %v340_v7  ;;  %v1505_v7 = vld [vmem:[#allocation14 + $0x10] sm:$0xff]  }
 0x24f   :  { %483 = vmatmul.mubr.bf16.vlgmr.msra.gmra.mrb[4].mxu0 %v341_v9  ;;  %v1507_v9 = vld [vmem:[#allocation14 + $0x20] sm:$0xff]  }
 0x250   :  { %1274 = vmatpush3.bf16.msra.mxu0 %v1480_v15 }
 0x251   :  { %1275 = vmatprep.subr.bf16.mxu0 %v1481_v16 }
 0x254   :  { %1276 = vmatpush3.bf16.msra.mxu0 %v1482_v17 }
 0x255   :  { %1277 = vmatprep.subr.bf16.mxu0 %v1483_v18 }
 0x258   :  { %1278 = vmatpush3.bf16.msra.mxu0 %v1484_v19 }
 0x259   :  { %1279 = vmatprep.subr.bf16.mxu0 %v1485_v20  ;;  %v1509_v20 = vld [vmem:[#allocation14 + $0x30] sm:$0xff]  }
 0x25c   :  { %1280 = vmatpush3.bf16.msra.mxu0 %v1486_v21  ;;  %v1510_v21 = vld [vmem:[#allocation14 + $0x38] sm:$0xff]  }
 0x25d   :  { %1281 = vmatprep.subr.bf16.mxu0 %v1487_v22  ;;  %v1243_v22 = vld [vmem:[%s2027_s12] ss:$0 sm:$0xff]  ;;  %s1687_s12 = scalar_lea.vmem %s1153_s7, 128 }
 0x25e   :  { %p1688_p8 = scmp.ne.s32.totalorder %s1153_s7, %s1687_s12  ;;  %p1693_p10 = scmp.lt.s32.totalorder %s1687_s12, %s1687_s12 }
 0x260   :  { %1282 = vmatpush3.bf16.msra.mxu0 %v1488_v23  ;;  %p1694_p11 = por %p1693_p10, %p1692_p9 }
 0x261   :  { %1283 = vmatprep.subr.bf16.mxu0 %v1489_v24 }
 0x262   :  { %p1695_p12 = pnand %p1694_p11, %p1688_p8 }
 0x264   :  { %1284 = vmatpush3.bf16.msra.mxu0 %v1490_v25 }
 0x265   :  { %1285 = vmatprep.subr.bf16.mxu0 %v1491_v43 }
 0x268   :  { %1286 = vmatpush3.bf16.msra.mxu0 %v1492_v44 }
 0x269   :  { %1287 = vmatprep.subr.bf16.mxu0 %v1493_v45 }
 0x26c   :  { %1288 = vmatpush3.bf16.msra.mxu0 %v1494_v46 }
 0x26d   :  { %1341 = vmatprep.subr.bf16.mxu0 %v1733_v0 }
 0x322   :  { %v484_v33 = vpop.f32.mrb[4].mxu0 }
 0x323   :  { %v485_v34 = vadd.f32 %v484_v33, %v363_v31  ;;  %v486_v35 = vpop.f32.mrb[5].mxu0 }
 0x324   :  { %v487_v36 = vadd.f32 %v486_v35, %v367_v32  ;;  %v488_v37 = vpop.f32.mrb[6].mxu0 }
 0x325   :  { %v491_v38 = vmax.f32 %v485_v34, 0.0  ;;  %v489_v39 = vpop.f32.mrb[7].mxu0 }
 0x326   :  { %v492_v40 = vmax.f32 %v487_v36, 0.0 }
 0x327   :  { %v493_v42 = vpack.c.bf16 %v491_v38, %v491_v38 }
 0x328   :  { %v494_v41 = vpack.c.bf16 %v492_v40, %v492_v40 }
 0x32a   :  { %731 = vmatprep.mubr.bf16.mxu1 %v494_v41 }
 0x32b   :  { %732 = vmatmul.mubr.bf16.vlgmr.msra.gmra.mrb[4].mxu1 %v493_v42 }
 0x32c   :  { %1377 = vmatprep.mubr.msk.bf16.mxu1 %vm1734_vm0, %v1733_v0  ;;  %1362 = vmatpush3.bf16.msra.mxu1 %v1503_v5 }
 0x32d   :  { %1363 = vmatprep.subr.bf16.mxu1 %v1733_v0 }
 0x330   :  { %1364 = vmatpush3.bf16.msra.mxu1 %v1504_v6 }
 0x331   :  { %1365 = vmatprep.subr.bf16.mxu1 %v1733_v0 }
 0x334   :  { %1366 = vmatpush3.bf16.msra.mxu1 %v1505_v7 }
 0x335   :  { %1367 = vmatprep.subr.bf16.mxu1 %v1733_v0 }
 0x338   :  { %1368 = vmatpush3.bf16.msra.mxu1 %v1506_v8 }
 0x339   :  { %1369 = vmatprep.subr.bf16.mxu1 %v1733_v0 }
 0x33c   :  { %1370 = vmatpush3.bf16.msra.mxu1 %v1507_v9 }
 0x33d   :  { %1371 = vmatprep.subr.bf16.mxu1 %v1733_v0 }
 0x340   :  { %1372 = vmatpush3.bf16.msra.mxu1 %v1508_v10 }
 0x341   :  { %1373 = vmatprep.subr.bf16.mxu1 %v1733_v0 }
 0x344   :  { %1374 = vmatpush3.bf16.msra.mxu1 %v1509_v20 }
 0x345   :  { %1375 = vmatprep.subr.bf16.mxu1 %v1733_v0 }
 0x348   :  { %1376 = vmatpush3.bf16.msra.mxu1 %v1510_v21 }
 0x3fe   :  { %v733_v50 = vpop.f32.mrb[4].mxu1 }
 0x3ff   :  { %v734_v51 = vadd.f32 %v733_v50, %v532_v48  ;;  %v735_v52 = vpop.f32.mrb[5].mxu1 }
 0x400   :  { %v736_v53 = vadd.f32 %v735_v52, %v536_v49  ;;  %v737_v54 = vpop.f32.mrb[6].mxu1 }
 0x401   :  { %v740_v55 = vmax.f32 %v734_v51, 0.0  ;;  %v738_v56 = vpop.f32.mrb[7].mxu1 }
 0x402   :  { %v741_v57 = vmax.f32 %v736_v53, 0.0 }
 0x403   :  { %v742_v60 = vpack.c.bf16 %v740_v55, %v740_v55 }
 0x404   :  { %v743_v58 = vpack.c.bf16 %v741_v57, %v741_v57 }
 0x406   :  { %911 = vmatprep.mubr.bf16.mxu0 %v743_v58 }
 0x407   :  { %912 = vmatmul.mubr.bf16.vlgmr.msra.gmra.mrb[8].mxu0 %v742_v60 }
 0x408   :  { %1342 = vmatpush3.bf16.msra.mxu0 %v1495_v59  ;;  %1357 = vmatprep.mubr.msk.bf16.mxu0 %vm1734_vm0, %v1733_v0 }
 0x409   :  { %1343 = vmatprep.subr.bf16.mxu0 %v1733_v0 }
 0x40c   :  { %1344 = vmatpush3.bf16.msra.mxu0 %v1496_v61 }
 0x40d   :  { %1345 = vmatprep.subr.bf16.mxu0 %v1733_v0 }
 0x410   :  { %1346 = vmatpush3.bf16.msra.mxu0 %v1497_v62 }
 0x411   :  { %1347 = vmatprep.subr.bf16.mxu0 %v1733_v0 }
 0x414   :  { %1348 = vmatpush3.bf16.msra.mxu0 %v1498_v63 }
 0x415   :  { %1349 = vmatprep.subr.bf16.mxu0 %v1733_v0 }
 0x418   :  { %1350 = vmatpush3.bf16.msra.mxu0 %v1499_v1 }
 0x419   :  { %1351 = vmatprep.subr.bf16.mxu0 %v1733_v0 }
 0x41c   :  { %1352 = vmatpush3.bf16.msra.mxu0 %v1500_v2 }
 0x41d   :  { %1353 = vmatprep.subr.bf16.mxu0 %v1733_v0 }
 0x420   :  { %1354 = vmatpush3.bf16.msra.mxu0 %v1501_v3 }
 0x421   :  { %1355 = vmatprep.subr.bf16.mxu0 %v1733_v0 }
 0x424   :  { %1356 = vmatpush3.bf16.msra.mxu0 %v1502_v4 }
 0x4da   :  { %v1289_v11 = vpop.f32.mrb[8].mxu0 }
 0x4db   :  { %v1290_v13 = vpop.f32.mrb[9].mxu0 }
 0x4dc   :  { %v1291_v14 = vadd.f32 %v1290_v13, %v1289_v11  ;;  %v1292_v15 = vpop.f32.mrb[10].mxu0 }
 0x4dd   :  { %v1293_v16 = vpop.f32.mrb[11].mxu0 }
 0x4de   :  { %v914_v17 = vadd.f32 %v1291_v14, %v1226_v12 }
 0x4e0   :  { %v919_v18 = vmax.f32 %v914_v17, 0.0 }
 0x4e2   :  { %v920_v19 = vpack.c.bf16 %v919_v18, %v919_v18 }
 0x4e4   :  { %1358 = vmatmul.mubr.bf16.vlgmr.msra.gmra.mrb[12].mxu0 %v920_v19 }
 0x5b7   :  { %v1026_v23 = vpop.f32.mrb[12].mxu0 }
 0x5b8   :  { %v1027_v24 = vadd.f32 %v1243_v22, %v1026_v23  ;;  %v1359_v25 = vpop.f32.mrb[13].mxu0 }
 0x5b9   :  { %v1029_v26 = vpop.f32.mrb[14].mxu0 }
 0x5ba   :  { %v1032_v27 = vmax.f32 %v1027_v24, 0.0  ;;  %v1360_v28 = vpop.f32.mrb[15].mxu0 }
 0x5bc   :  { %v1033_v29 = vpack.c.bf16 %v1032_v27, %v1032_v27 }
 0x5be   :  { %1378 = vmatmul.mubr.bf16.vlgmr.msra.gmra.mrb[8].mxu1 %v1033_v29 }
 0x691   :  { %v1139_v0 = vpop.f32.mrb[8].mxu1 }
 0x692   :  { %v1140_v31 = vadd.f32 %v1252_v30, %v1139_v0  ;;  %v1379_v32 = vpop.f32.mrb[9].mxu1 }
 0x693   :  { %v1142_v33 = vpop.f32.mrb[10].mxu1 }
 0x694   :  { %1145 = vst [vmem:[#allocation16] sm:$0xff] %v1140_v31  ;;  %v1380_v34 = vpop.f32.mrb[11].mxu1 }
 0x695   :  { %1698 = shalt.err (!%p1695_p12)
}
 0x696   :  { %s1699_s14 = scalar_lea.hbm %s2030_s15, 128 }
 0x697   :  { %p1700_p13 = scmp.ne.s32.totalorder %s2030_s15, %s1699_s14  ;;  %p1703_p0 = scmp.lt.u32.totalorder %s1699_s14, %s2030_s15 }
 0x699   :  { %p1705_p1 = pnand %p1703_p0, %p1700_p13 }
 0x69b   :  { %1708 = shalt.err (!%p1705_p1)
}
 0x69c   :  { %1155 = dma.vmem_to_hbm [thread:$0]  %s1153_s7, 128, %s2030_s15, [#allocation4]  }
 0x69d   :  { %1719 = dma.done.wait [#allocation4], 128  }
 0x69e   :  { %1720 = vsyncadd [#allocation4], 4294967168 }
 0x69f   :  { %1159 = vsyncpa [#allocation3], 1 }
 0x6a0   :  { %1160 = vsyncpa [#allocation6], 1 }
 0x6a1   :  { %1161 = vsyncpa [#allocation9], 1 }
 0x6a2   :  { %1162 = vsyncpa [#allocation12], 1 }
 0x6a3   :  { %1163 = vsyncpa [#allocation15], 1 }
 0x6a4   :  { %1164 = vsyncpa [#allocation4], 1 }

</bundles_post_ra>
